<compile_context>
chip_gen: v6e
topology: v6e:2x2x1
jax: 0.10.0
libtpu: 0.0.40
codegen_flags: <defaults>
</compile_context>

<pallas_src>
import jax
import jax.numpy as jnp
from jax.experimental import pallas as pl
from jax.experimental.pallas import tpu as pltpu


def _round_up(a, m):
    return -(-a // m) * m


def _cdiv(a, b):
    return -(-a // b)


def _num_tensorcores_per_chip():
    """2 on v7x (two TensorCores/chip), else 1. Best-effort; falls back to 1."""
    try:
        kind = (getattr(jax.devices()[0], "device_kind", "") or "").lower()
        if "v7" in kind:
            return 2
    except Exception:
        pass
    return 1


def _choose_tiling(batch, *, max_tile_b, num_cores):
    """Pick (tile_b, padded_batch, steps): few big tiles, tb a multiple of 8,
    and an even split across TensorCores on v7x when there is enough work."""
    rows = _round_up(max(batch, 8), 8)
    steps = _cdiv(rows, max_tile_b)
    if num_cores > 1 and rows >= 8 * num_cores:
        steps = max(steps, num_cores)
        steps = _round_up(steps, num_cores)
    tb = _round_up(_cdiv(rows, steps), 8)
    padded = steps * tb
    return tb, padded, steps


def dqn_kernel(x_ref, w1_ref, b1_ref, w2_ref, b2_ref, w3_ref, b3_ref, o_ref):
    # Three MXU matmuls with f32 accumulation; bias-add / ReLU epilogues in f32.
    # Only the first matmul is fed in compute_dtype (bf16/f32); h1/h2 stay f32.
    h1 = jnp.dot(x_ref[...], w1_ref[...],
                 preferred_element_type=jnp.float32) + b1_ref[...]
    h1 = jnp.maximum(h1, 0.0)

    h2 = jnp.dot(h1, w2_ref[...],
                 preferred_element_type=jnp.float32) + b2_ref[...]
    h2 = jnp.maximum(h2, 0.0)

    out = jnp.dot(h2, w3_ref[...],
                  preferred_element_type=jnp.float32) + b3_ref[...]
    o_ref[...] = out.astype(o_ref.dtype)


def prepare_dqn_params(params, *, compute_dtype=jnp.bfloat16):
    """One-time (out-of-hot-path) weight prep: cast the first-layer weight to
    the MXU feed dtype; everything else stays f32."""
    w1, b1, w2, b2, w3, b3 = params
    return (w1.astype(compute_dtype),
            b1.astype(jnp.float32),
            w2.astype(jnp.float32),
            b2.astype(jnp.float32),
            w3.astype(jnp.float32),
            b3.astype(jnp.float32))


def dqn_forward(x, prepared_params, *, max_tile_b=4096):
    """Run the DQN MLP on x [batch, input_size] -> [batch, output_size]."""
    w1, b1, w2, b2, w3, b3 = prepared_params
    batch, in_size = x.shape
    hidden = w1.shape[1]
    out_size = w3.shape[1]

    # x feed dtype follows the prepared w1 (bf16 by default).
    xc = x.astype(w1.dtype)

    tb, padded_batch, steps = _choose_tiling(
        batch, max_tile_b=max_tile_b, num_cores=_num_tensorcores_per_chip())
    if padded_batch != batch:
        xc = jnp.pad(xc, ((0, padded_batch - batch), (0, 0)))

    # Resident operands: weight/bias index_maps always return block 0, so they
    # stay in VMEM across all batch tiles; x/out are pipelined along the grid.
    def resident(a):
        return pl.BlockSpec(a.shape, lambda i: (0,) * a.ndim)

    in_specs = [
        pl.BlockSpec((tb, in_size), lambda i: (i, 0)),  # x tile per grid step
        resident(w1), resident(b1),
        resident(w2), resident(b2),
        resident(w3), resident(b3),
    ]
    out_specs = pl.BlockSpec((tb, out_size), lambda i: (i, 0))

    flops = 2 * padded_batch * (in_size * hidden + hidden * hidden
                                + hidden * out_size)
    bytes_accessed = int(
        xc.size * xc.dtype.itemsize
        + sum(a.size * a.dtype.itemsize for a in (w1, b1, w2, b2, w3, b3))
        + padded_batch * out_size * 4)

    out = pl.pallas_call(
        dqn_kernel,
        out_shape=jax.ShapeDtypeStruct((padded_batch, out_size), jnp.float32),
        grid=(steps,),
        in_specs=in_specs,
        out_specs=out_specs,
        compiler_params=pltpu.CompilerParams(
            dimension_semantics=("parallel",)),
        cost_estimate=pl.CostEstimate(
            flops=flops, transcendentals=0, bytes_accessed=bytes_accessed),
    )(xc, w1, b1, w2, b2, w3, b3)

    return out[:batch, :]


def init_dqn_params(key, input_size, output_size, hidden=32):
    """Deterministic init mimicking PyTorch nn.Linear default:
    U(-1/sqrt(fan_in), 1/sqrt(fan_in)) for both weight and bias."""
    def linear(k, fan_in, fan_out):
        kw, kb = jax.random.split(k)
        bound = 1.0 / jnp.sqrt(jnp.float32(fan_in))
        w = jax.random.uniform(kw, (fan_in, fan_out), jnp.float32, -bound, bound)
        b = jax.random.uniform(kb, (1, fan_out), jnp.float32, -bound, bound)
        return w, b

    k1, k2, k3 = jax.random.split(key, 3)
    w1, b1 = linear(k1, input_size, hidden)
    w2, b2 = linear(k2, hidden, hidden)
    w3, b3 = linear(k3, hidden, output_size)
    return (w1, b1, w2, b2, w3, b3)


def _ref_forward(x, params):
    w1, b1, w2, b2, w3, b3 = params
    h = jnp.maximum(x @ w1 + b1, 0.0)
    h = jnp.maximum(h @ w2 + b2, 0.0)
    return h @ w3 + b3


if __name__ == "__main__":
    # CartPole-ish DQN shapes: input_size=4 observations, output_size=2 actions.
    batch, input_size, output_size = 8, 4, 2

    key = jax.random.PRNGKey(0)
    kx, kp = jax.random.split(key)
    x = jax.random.normal(kx, (batch, input_size), jnp.float32)
    params = init_dqn_params(kp, input_size, output_size)
    ref = _ref_forward(x, params)

    # f32 feed path (tight tolerance against the plain-JAX reference).
    prep_f32 = prepare_dqn_params(params, compute_dtype=jnp.float32)
    out = jax.block_until_ready(dqn_forward(x, prep_f32))
    assert out.shape == (batch, output_size)
    assert jnp.allclose(out, ref, atol=1e-5, rtol=1e-5)

    # Default bf16 input feed (f32 accumulate + f32 epilogue) — looser tolerance.
    prep_bf16 = prepare_dqn_params(params)
    out_bf16 = jax.block_until_ready(dqn_forward(x, prep_bf16))
    assert out_bf16.shape == (batch, output_size)
    assert jnp.allclose(out_bf16, ref, atol=5e-2, rtol=5e-2)

    # Larger batch; a small max_tile_b forces a multi-step pipelined grid
    # (resident weights, x/out DMA overlapped behind compute, batch padding).
    big = 1000
    xb = jax.random.normal(kx, (big, input_size), jnp.float32)
    ref_big = _ref_forward(xb, params)
    out_big = jax.block_until_ready(dqn_forward(xb, prep_f32, max_tile_b=256))
    assert out_big.shape == (big, output_size)
    assert jnp.allclose(out_big, ref_big, atol=1e-4, rtol=1e-4)

    # Default (big-tile) path on the larger batch as well, bf16 feed.
    out_big_bf16 = jax.block_until_ready(dqn_forward(xb, prep_bf16))
    assert jnp.allclose(out_big_bf16, ref_big, atol=5e-2, rtol=5e-2)

    print("KERNEL_OK")
</pallas_src>

<mosaic_0001>
module attributes {stable_mosaic.version = 11 : i64} {
  func.func @dqn_kernel(%arg0: i32, %arg1: memref<8x4xf32, #tpu.memory_space<vmem>>, %arg2: memref<4x32xf32, #tpu.memory_space<vmem>>, %arg3: memref<1x32xf32, #tpu.memory_space<vmem>>, %arg4: memref<32x32xf32, #tpu.memory_space<vmem>>, %arg5: memref<1x32xf32, #tpu.memory_space<vmem>>, %arg6: memref<32x2xf32, #tpu.memory_space<vmem>>, %arg7: memref<1x2xf32, #tpu.memory_space<vmem>>, %arg8: memref<8x2xf32, #tpu.memory_space<vmem>>) attributes {dimension_semantics = [#tpu.dimension_semantics<parallel>], iteration_bounds = array<i64: 1>, scalar_prefetch = 0 : i64, scratch_operands = 0 : i64, tpu.core_type = #tpu.core_type<tc>, window_params = [{transform_indices = @transform_0, window_bounds = array<i64: 8, 4>}, {pipeline_mode = #tpu.pipeline_mode<synchronous>, transform_indices = @transform_1, window_bounds = array<i64: 4, 32>}, {pipeline_mode = #tpu.pipeline_mode<synchronous>, transform_indices = @transform_2, window_bounds = array<i64: 1, 32>}, {pipeline_mode = #tpu.pipeline_mode<synchronous>, transform_indices = @transform_3, window_bounds = array<i64: 32, 32>}, {pipeline_mode = #tpu.pipeline_mode<synchronous>, transform_indices = @transform_4, window_bounds = array<i64: 1, 32>}, {pipeline_mode = #tpu.pipeline_mode<synchronous>, transform_indices = @transform_5, window_bounds = array<i64: 32, 2>}, {pipeline_mode = #tpu.pipeline_mode<synchronous>, transform_indices = @transform_6, window_bounds = array<i64: 1, 2>}, {transform_indices = @transform_7, window_bounds = array<i64: 8, 2>}]} {
    %c0 = arith.constant 0 : index
    %c0_0 = arith.constant 0 : index
    %0 = vector.load %arg1[%c0, %c0_0] : memref<8x4xf32, #tpu.memory_space<vmem>>, vector<8x4xf32>
    %c0_1 = arith.constant 0 : index
    %c0_2 = arith.constant 0 : index
    %1 = vector.load %arg2[%c0_1, %c0_2] : memref<4x32xf32, #tpu.memory_space<vmem>>, vector<4x32xf32>
    %cst = arith.constant dense<0.000000e+00> : vector<8x32xf32>
    %2 = tpu.matmul %0, %1, %cst {dimension_numbers = #tpu.dot_dimension_numbers<[1], [0], [0], [1], [0, 0, 1, 1], [], []>} : vector<8x4xf32>, vector<4x32xf32>, vector<8x32xf32> -> vector<8x32xf32>
    %c0_3 = arith.constant 0 : index
    %c0_4 = arith.constant 0 : index
    %3 = vector.load %arg3[%c0_3, %c0_4] : memref<1x32xf32, #tpu.memory_space<vmem>>, vector<1x32xf32>
    %4 = vector.broadcast %3 : vector<1x32xf32> to vector<8x32xf32>
    %5 = arith.addf %2, %4 : vector<8x32xf32>
    %cst_5 = arith.constant 0.000000e+00 : f32
    %6 = vector.broadcast %cst_5 : f32 to vector<8x32xf32>
    %7 = arith.maximumf %5, %6 : vector<8x32xf32>
    %c0_6 = arith.constant 0 : index
    %c0_7 = arith.constant 0 : index
    %8 = vector.load %arg4[%c0_6, %c0_7] : memref<32x32xf32, #tpu.memory_space<vmem>>, vector<32x32xf32>
    %cst_8 = arith.constant dense<0.000000e+00> : vector<8x32xf32>
    %9 = tpu.matmul %7, %8, %cst_8 {dimension_numbers = #tpu.dot_dimension_numbers<[1], [0], [0], [1], [0, 0, 1, 1], [], []>} : vector<8x32xf32>, vector<32x32xf32>, vector<8x32xf32> -> vector<8x32xf32>
    %c0_9 = arith.constant 0 : index
    %c0_10 = arith.constant 0 : index
    %10 = vector.load %arg5[%c0_9, %c0_10] : memref<1x32xf32, #tpu.memory_space<vmem>>, vector<1x32xf32>
    %11 = vector.broadcast %10 : vector<1x32xf32> to vector<8x32xf32>
    %12 = arith.addf %9, %11 : vector<8x32xf32>
    %cst_11 = arith.constant 0.000000e+00 : f32
    %13 = vector.broadcast %cst_11 : f32 to vector<8x32xf32>
    %14 = arith.maximumf %12, %13 : vector<8x32xf32>
    %c0_12 = arith.constant 0 : index
    %c0_13 = arith.constant 0 : index
    %15 = vector.load %arg6[%c0_12, %c0_13] : memref<32x2xf32, #tpu.memory_space<vmem>>, vector<32x2xf32>
    %cst_14 = arith.constant dense<0.000000e+00> : vector<8x2xf32>
    %16 = tpu.matmul %14, %15, %cst_14 {dimension_numbers = #tpu.dot_dimension_numbers<[1], [0], [0], [1], [0, 0, 1, 1], [], []>} : vector<8x32xf32>, vector<32x2xf32>, vector<8x2xf32> -> vector<8x2xf32>
    %c0_15 = arith.constant 0 : index
    %c0_16 = arith.constant 0 : index
    %17 = vector.load %arg7[%c0_15, %c0_16] : memref<1x2xf32, #tpu.memory_space<vmem>>, vector<1x2xf32>
    %18 = vector.broadcast %17 : vector<1x2xf32> to vector<8x2xf32>
    %19 = arith.addf %16, %18 : vector<8x2xf32>
    %c0_17 = arith.constant 0 : index
    %c0_18 = arith.constant 0 : index
    %20 = vector.load %arg8[%c0_17, %c0_18] : memref<8x2xf32, #tpu.memory_space<vmem>>, vector<8x2xf32>
    tpu.vector_store %arg8[%c0_17, %c0_18], %19 {strides = array<i32>} : memref<8x2xf32, #tpu.memory_space<vmem>>, vector<8x2xf32>,
    return
  }
  func.func @transform_0(%arg0: i32) -> (i32, i32) {
    %c0_i32 = arith.constant 0 : i32
    %c0_i32_0 = arith.constant 0 : i32
    return %arg0, %c0_i32 : i32, i32
  }
  func.func @transform_1(%arg0: i32) -> (i32, i32) {
    %c0_i32 = arith.constant 0 : i32
    %c0_i32_0 = arith.constant 0 : i32
    %c0_i32_1 = arith.constant 0 : i32
    return %c0_i32, %c0_i32_0 : i32, i32
  }
  func.func @transform_2(%arg0: i32) -> (i32, i32) {
    %c0_i32 = arith.constant 0 : i32
    %c0_i32_0 = arith.constant 0 : i32
    %c0_i32_1 = arith.constant 0 : i32
    return %c0_i32, %c0_i32_0 : i32, i32
  }
  func.func @transform_3(%arg0: i32) -> (i32, i32) {
    %c0_i32 = arith.constant 0 : i32
    %c0_i32_0 = arith.constant 0 : i32
    %c0_i32_1 = arith.constant 0 : i32
    return %c0_i32, %c0_i32_0 : i32, i32
  }
  func.func @transform_4(%arg0: i32) -> (i32, i32) {
    %c0_i32 = arith.constant 0 : i32
    %c0_i32_0 = arith.constant 0 : i32
    %c0_i32_1 = arith.constant 0 : i32
    return %c0_i32, %c0_i32_0 : i32, i32
  }
  func.func @transform_5(%arg0: i32) -> (i32, i32) {
    %c0_i32 = arith.constant 0 : i32
    %c0_i32_0 = arith.constant 0 : i32
    %c0_i32_1 = arith.constant 0 : i32
    return %c0_i32, %c0_i32_0 : i32, i32
  }
  func.func @transform_6(%arg0: i32) -> (i32, i32) {
    %c0_i32 = arith.constant 0 : i32
    %c0_i32_0 = arith.constant 0 : i32
    %c0_i32_1 = arith.constant 0 : i32
    return %c0_i32, %c0_i32_0 : i32, i32
  }
  func.func @transform_7(%arg0: i32) -> (i32, i32) {
    %c0_i32 = arith.constant 0 : i32
    %c0_i32_0 = arith.constant 0 : i32
    return %arg0, %c0_i32 : i32, i32
  }
}

</mosaic_0001>

<bundles_post_ra>
// kernel: tpu_custom_call.1
= control target key start
LH: loop header
LB: loop body
LE: loop exit
PB: predicated region body
PF: predicated region fallthrough
CT: control target
= control target key end

     0   :  { %vm39_vm0 = vcmask 1043456   ;;  %vm35_vm1 = vcmask 31744   ;;  %v338_v0 = vmov 0.0   ;;  %vm339_vm2 = vmmov 0   ;;  %s424_s1 = inlined_call_operand.vmem [shape: f32[4,32], index: 1, kind: input, shape index: {}]   ;;  %s425_s0 = inlined_call_operand.vmem [shape: f32[8,4], index: 0, kind: input, shape index: {}]   ;;  %s426_s3 = inlined_call_operand.vmem [shape: f32[32,32], index: 3, kind: input, shape index: {}]   ;;  %s427_s5 = inlined_call_operand.vmem [shape: f32[32,2], index: 5, kind: input, shape index: {}]   ;;  %s428_s2 = inlined_call_operand.vmem [shape: f32[1,32], index: 2, kind: input, shape index: {}]   ;;  %s429_s4 = inlined_call_operand.vmem [shape: f32[1,32], index: 4, kind: input, shape index: {}]   ;;  %s430_s6 = inlined_call_operand.vmem [shape: f32[1,2], index: 6, kind: input, shape index: {}]   ;;  %s431_s7 = inlined_call_operand.vmem [shape: f32[8,2], index: 7, kind: output, shape index: {}]  }
   0x1   :  { %309 = vmatprep.subr.mxu0 %v338_v0  ;;  %v27_v1 = vld [vmem:[%s424_s1] sm:$0xf]  ;;  %311 = vmatprep.mubr.msk.f32.mxu0 %vm339_vm2, %v338_v0  ;;  %v117_v3 = vld [vmem:[%s426_s3 + $0x18] sm:$0xff]  ;;  %v116_v4 = vld [vmem:[%s426_s3 + $0x10] sm:$0xff]  ;;  %vm125_vm3 = vcmask 261120   ;;  %vm284_vm4 = vcmask 15360  }
   0x2   :  { %v26_v2 = vld [vmem:[%s425_s0] sm:$0xff]  ;;  %310 = vmatpush3.msk.msra.mxu0 %vm39_vm0, %v27_v1  ;;  %314 = vmatprep.subr.mxu1 %v338_v0  ;;  %v115_v5 = vld [vmem:[%s426_s3 + $0x8] sm:$0xff]  ;;  %v203_v7 = vld [vmem:[%s427_s5 + $0x18] sm:$0xff] }
   0x3   :  { %312 = vmatmul.mubr.msk.f32.vlgmr.msra.gmra.mxu0 %vm35_vm1, %v26_v2  ;;  %315 = vmatpush3.msra.mxu1 %v117_v3  ;;  %v114_v6 = vld [vmem:[%s426_s3] sm:$0xff]  ;;  %v202_v13 = vld [vmem:[%s427_s5 + $0x10] sm:$0xff]  ;;  %v201_v14 = vld [vmem:[%s427_s5 + $0x8] sm:$0xff] }
   0x4   :  { %316 = vmatprep.subr.mxu1 %v338_v0  ;;  %322 = vmatprep.mubr.msk.f32.mxu1 %vm339_vm2, %v338_v0  ;;  %v290_v8 = vld [vmem:[%s428_s2] ss:$0 sm:$0xff] }
   0x5   :  { %325 = vmatprep.subr.mxu0 %v338_v0  ;;  %333 = vmatprep.mubr.msk.f32.mxu0 %vm339_vm2, %v338_v0  ;;  %v200_v15 = vld [vmem:[%s427_s5] sm:$0xff] }
   0x6   :  { %317 = vmatpush3.msra.mxu1 %v116_v4  ;;  %326 = vmatpush3.msra.mxu0 %v203_v7  ;;  %v293_v16 = vld [vmem:[%s429_s4] ss:$0 sm:$0xff] }
   0x7   :  { %318 = vmatprep.subr.mxu1 %v338_v0  ;;  %327 = vmatprep.subr.mxu0 %v338_v0  ;;  %v295_v21 = vld [vmem:[%s430_s6] ss:$0 sm:$0xff] }
   0x8   :  { %319 = vmatpush3.msra.mxu1 %v115_v5  ;;  %328 = vmatpush3.msra.mxu0 %v202_v13 }
   0x9   :  { %320 = vmatprep.subr.mxu1 %v338_v0  ;;  %329 = vmatprep.subr.mxu0 %v338_v0 }
   0xa   :  { %321 = vmatpush3.msra.mxu1 %v114_v6  ;;  %330 = vmatpush3.msra.mxu0 %v201_v14 }
   0xb   :  { %331 = vmatprep.subr.mxu0 %v338_v0 }
   0xc   :  { %332 = vmatpush3.msra.mxu0 %v200_v15 }
  0xc3   :  { %v109_v9 = vpop.f32.mrf.mxu0 }
  0xc4   :  { %v110_v10 = vadd.f32 %v290_v8, %v109_v9 }
  0xc5   :  { %v313_v11 = vpop.f32.mrf.mxu0 }
  0xc6   :  { %v113_v12 = vmax.f32 %v110_v10, 0.0 }
  0xc8   :  { %323 = vmatmul.mubr.msk.f32.vlgmr.msra.gmra.mxu1 %vm125_vm3, %v113_v12 }
 0x188   :  { %v195_v17 = vpop.f32.mrf.mxu1 }
 0x189   :  { %v196_v18 = vadd.f32 %v293_v16, %v195_v17 }
 0x18a   :  { %v324_v19 = vpop.f32.mrf.mxu1 }
 0x18b   :  { %v199_v20 = vmax.f32 %v196_v18, 0.0 }
 0x18d   :  { %334 = vmatmul.mubr.msk.f32.vlgmr.msra.gmra.mxu0 %vm125_vm3, %v199_v20 }
 0x24d   :  { %v280_v22 = vpop.f32.mrf.mxu0 }
 0x24e   :  { %v281_v23 = vadd.f32 %v295_v21, %v280_v22 }
 0x24f   :  { %v335_v24 = vpop.f32.mrf.mxu0 }
 0x250   :  { %285 = vst.msk [vmem:[%s431_s7] sm:$0xff] %vm284_vm4, %v281_v23 }

</bundles_post_ra>
